<compile_context>
chip_gen: v7x
topology: tpu7x:2x2x1
jax: 0.10.0
libtpu: 0.0.40
codegen_flags: <defaults>
</compile_context>

<pallas_src>
import math
import functools

import jax
import jax.numpy as jnp
from jax import lax
from jax.experimental import pallas as pl
from jax.experimental.pallas import tpu as pltpu


# ---------------------------- Pallas kernel ----------------------------

def mha_kernel(q_ref, k_ref, v_ref, kmask_ref, qmask_ref,
               wq_ref, bq_ref, wk_ref, bk_ref, wv_ref, bv_ref,
               wo_ref, bo_ref, o_ref, *, num_heads, scale, seq_mask):
    f32 = jnp.float32
    mxu_dt = jnp.bfloat16  # MXU-native operand dtype; accumulation stays f32.

    xq = q_ref[0]          # (Lq, D) f32
    xk = k_ref[0]          # (Lk, D)
    xv = v_ref[0]          # (Lk, D)
    lq, d = xq.shape
    lk = xk.shape[0]
    dh = d // num_heads

    def matmul(a, b):
        return jnp.dot(a.astype(mxu_dt), b.astype(mxu_dt),
                       preferred_element_type=f32)

    # Fused input projections: one (L, D) x (D, D) MXU matmul each, bias add on VPU.
    q = matmul(xq, wq_ref[...]) + bq_ref[...]      # (Lq, D)
    k = matmul(xk, wk_ref[...]) + bk_ref[...]      # (Lk, D)
    v = matmul(xv, wv_ref[...]) + bv_ref[...]      # (Lk, D)

    # Additive key-side (+ optional causal) mask, built in-kernel.
    key_masked = kmask_ref[0] > 0.5                # (1, Lk) bool
    if seq_mask:
        row = lax.broadcasted_iota(jnp.int32, (lq, lk), 0)
        col = lax.broadcasted_iota(jnp.int32, (lq, lk), 1)
        key_masked = key_masked | (col > row)      # (Lq, Lk)
    madd = jnp.where(key_masked, f32(-1e32), f32(0.0))

    # Per-head attention; all heads of this batch element are processed inside one grid
    # step (static unroll -> fully visible to the scheduler, no per-head launch cost).
    ctx_heads = []
    for h in range(num_heads):
        lo = h * dh
        qh = q[:, lo:lo + dh]                      # (Lq, dh)  static lane slices
        kh = k[:, lo:lo + dh]                      # (Lk, dh)
        vh = v[:, lo:lo + dh]                      # (Lk, dh)

        s = matmul(qh, kh.T) * scale + madd        # (Lq, Lk) f32
        m = jnp.max(s, axis=-1, keepdims=True)
        e = jnp.exp(s - m)
        p = e * pl.reciprocal(jnp.sum(e, axis=-1, keepdims=True), approx=True)

        ctx_heads.append(matmul(p, vh))            # (Lq, dh)

    ctx = jnp.concatenate(ctx_heads, axis=-1)      # (Lq, D)  heads concatenated on lanes
    # Query-side mask == zeroing rows of p; applied once as a (Lq, 1) row multiply.
    ctx = ctx * (1.0 - qmask_ref[0])

    out = matmul(ctx, wo_ref[...]) + bo_ref[...]   # output projection, lane-dense store
    o_ref[0] = out.astype(o_ref.dtype)


# ---------------------------- wrapper ----------------------------

def multi_head_attention(params, x_q, x_k, x_v, q_mask, k_mask, *,
                         num_heads, seq_mask=False):
    b, lq, d = x_q.shape
    lk = x_k.shape[1]
    assert d % num_heads == 0
    scale = 1.0 / math.sqrt(d)                     # reference divides by sqrt(hidden_dim)

    # Tiny per-row mask vectors (B*Lk + B*Lq floats) instead of (B*H, Lq, Lk) tensors.
    kmask_f = k_mask.astype(jnp.float32).reshape(b, 1, lk)
    qmask_f = q_mask.astype(jnp.float32).reshape(b, lq, 1)

    kernel = functools.partial(mha_kernel, num_heads=num_heads,
                               scale=scale, seq_mask=seq_mask)

    def full_spec(shape):
        return pl.BlockSpec(shape, lambda bb: tuple(0 for _ in shape))

    return pl.pallas_call(
        kernel,
        grid=(b,),
        in_specs=[
            pl.BlockSpec((1, lq, d), lambda bb: (bb, 0, 0)),   # query
            pl.BlockSpec((1, lk, d), lambda bb: (bb, 0, 0)),   # key
            pl.BlockSpec((1, lk, d), lambda bb: (bb, 0, 0)),   # value
            pl.BlockSpec((1, 1, lk), lambda bb: (bb, 0, 0)),   # k_mask (f32, 1 = masked)
            pl.BlockSpec((1, lq, 1), lambda bb: (bb, 0, 0)),   # q_mask (f32, 1 = masked)
            full_spec((d, d)), full_spec((1, d)),              # Wq, bq (resident in VMEM)
            full_spec((d, d)), full_spec((1, d)),              # Wk, bk
            full_spec((d, d)), full_spec((1, d)),              # Wv, bv
            full_spec((d, d)), full_spec((1, d)),              # Wo, bo
        ],
        out_specs=pl.BlockSpec((1, lq, d), lambda bb: (bb, 0, 0)),
        out_shape=jax.ShapeDtypeStruct((b, lq, d), jnp.float32),
        compiler_params=pltpu.CompilerParams(
            dimension_semantics=("parallel",),
            vmem_limit_bytes=32 * 1024 * 1024,
        ),
    )(x_q, x_k, x_v, kmask_f, qmask_f,
      params['wq'], params['bq'], params['wk'], params['bk'],
      params['wv'], params['bv'], params['wo'], params['bo'])


# ---------------------------- pure-JAX reference (mirrors the PyTorch module) ----------------------------

def mha_reference(params, x_q, x_k, x_v, q_mask, k_mask, *, num_heads, seq_mask=False):
    b, lq, d = x_q.shape
    lk = x_k.shape[1]
    dh = d // num_heads

    def proj(x, w, bias, l):
        y = x.reshape(b * l, d) @ w + bias
        return y.reshape(b, l, num_heads, dh).transpose(0, 2, 1, 3)

    Q = proj(x_q, params['wq'], params['bq'], lq)
    K = proj(x_k, params['wk'], params['bk'], lk)
    V = proj(x_v, params['wv'], params['bv'], lk)

    s = jnp.einsum('bhqd,bhkd->bhqk', Q, K) / math.sqrt(d)
    km = jnp.broadcast_to(k_mask[:, None, None, :], s.shape)
    if seq_mask:
        km = km | jnp.triu(jnp.ones((lq, lk), dtype=bool), k=1)[None, None, :, :]
    s = s + jnp.where(km, jnp.float32(-1e32), jnp.float32(0.0))
    p = jax.nn.softmax(s, axis=-1)
    p = p * (~q_mask)[:, None, :, None].astype(jnp.float32)
    ctx = jnp.einsum('bhqk,bhkd->bhqd', p, V)
    ctx = ctx.transpose(0, 2, 1, 3).reshape(b, lq, d)
    return ctx @ params['wo'] + params['bo']


# ---------------------------- deterministic parameter init ----------------------------

def init_params(key, hidden_dim):
    def lin(k, fan_in, fan_out):
        bound = 1.0 / math.sqrt(fan_in)
        kw, kb = jax.random.split(k)
        w = jax.random.uniform(kw, (fan_in, fan_out), jnp.float32, -bound, bound)
        bvec = jax.random.uniform(kb, (1, fan_out), jnp.float32, -bound, bound)
        return w, bvec

    kq, kk, kv, ko = jax.random.split(key, 4)
    wq, bq = lin(kq, hidden_dim, hidden_dim)
    wk, bk = lin(kk, hidden_dim, hidden_dim)
    wv, bv = lin(kv, hidden_dim, hidden_dim)
    wo, bo = lin(ko, hidden_dim, hidden_dim)
    return dict(wq=wq, bq=bq, wk=wk, bk=bk, wv=wv, bv=bv, wo=wo, bo=bo)


# ---------------------------- main ----------------------------

if __name__ == "__main__":
    B, Lq, Lk = 2, 8, 8
    hidden_dim, num_heads = 32, 4

    root = jax.random.PRNGKey(0)
    k0, k1, k2, k3 = jax.random.split(root, 4)
    query = jax.random.normal(k0, (B, Lq, hidden_dim), jnp.float32)
    key_in = jax.random.normal(k1, (B, Lk, hidden_dim), jnp.float32)
    value_in = jax.random.normal(k2, (B, Lk, hidden_dim), jnp.float32)

    # boolean padding masks: True = padded/masked position
    q_mask = jnp.zeros((B, Lq), dtype=bool).at[1, Lq - 1].set(True)
    k_mask = jnp.zeros((B, Lk), dtype=bool).at[1, Lk - 2:].set(True)

    params = init_params(k3, hidden_dim)

    # causal (decoder self-attn style) and non-causal (cross-attn style) paths
    out_causal = multi_head_attention(params, query, key_in, value_in, q_mask, k_mask,
                                      num_heads=num_heads, seq_mask=True)
    out_cross = multi_head_attention(params, query, key_in, value_in, q_mask, k_mask,
                                     num_heads=num_heads, seq_mask=False)
    out_causal, out_cross = jax.block_until_ready((out_causal, out_cross))

    assert out_causal.shape == (B, Lq, hidden_dim)
    assert out_cross.shape == (B, Lq, hidden_dim)
    assert bool(jnp.all(jnp.isfinite(out_causal)))
    assert bool(jnp.all(jnp.isfinite(out_cross)))

    # correctness vs. a pure-JAX f32 reference of the PyTorch module
    # (tolerance covers bf16 MXU operands + approx reciprocal)
    ref_causal = mha_reference(params, query, key_in, value_in, q_mask, k_mask,
                               num_heads=num_heads, seq_mask=True)
    ref_cross = mha_reference(params, query, key_in, value_in, q_mask, k_mask,
                              num_heads=num_heads, seq_mask=False)
    assert bool(jnp.allclose(out_causal, ref_causal, atol=5e-2, rtol=5e-2))
    assert bool(jnp.allclose(out_cross, ref_cross, atol=5e-2, rtol=5e-2))

    print("KERNEL_OK")
</pallas_src>

<mosaic_0001>
module attributes {stable_mosaic.version = 11 : i64} {
  func.func @mha_kernel(%arg0: i32, %arg1: memref<1x8x32xf32, #tpu.memory_space<vmem>>, %arg2: memref<1x8x32xf32, #tpu.memory_space<vmem>>, %arg3: memref<1x8x32xf32, #tpu.memory_space<vmem>>, %arg4: memref<1x1x8xf32, #tpu.memory_space<vmem>>, %arg5: memref<1x8x1xf32, #tpu.memory_space<vmem>>, %arg6: memref<32x32xf32, #tpu.memory_space<vmem>>, %arg7: memref<1x32xf32, #tpu.memory_space<vmem>>, %arg8: memref<32x32xf32, #tpu.memory_space<vmem>>, %arg9: memref<1x32xf32, #tpu.memory_space<vmem>>, %arg10: memref<32x32xf32, #tpu.memory_space<vmem>>, %arg11: memref<1x32xf32, #tpu.memory_space<vmem>>, %arg12: memref<32x32xf32, #tpu.memory_space<vmem>>, %arg13: memref<1x32xf32, #tpu.memory_space<vmem>>, %arg14: memref<1x8x32xf32, #tpu.memory_space<vmem>>) attributes {dimension_semantics = [#tpu.dimension_semantics<parallel>], iteration_bounds = array<i64: 2>, scalar_prefetch = 0 : i64, scratch_operands = 0 : i64, tpu.core_type = #tpu.core_type<tc>, window_params = [{transform_indices = @transform_0, window_bounds = array<i64: 1, 8, 32>}, {transform_indices = @transform_1, window_bounds = array<i64: 1, 8, 32>}, {transform_indices = @transform_2, window_bounds = array<i64: 1, 8, 32>}, {transform_indices = @transform_3, window_bounds = array<i64: 1, 1, 8>}, {transform_indices = @transform_4, window_bounds = array<i64: 1, 8, 1>}, {pipeline_mode = #tpu.pipeline_mode<synchronous>, transform_indices = @transform_5, window_bounds = array<i64: 32, 32>}, {pipeline_mode = #tpu.pipeline_mode<synchronous>, transform_indices = @transform_6, window_bounds = array<i64: 1, 32>}, {pipeline_mode = #tpu.pipeline_mode<synchronous>, transform_indices = @transform_7, window_bounds = array<i64: 32, 32>}, {pipeline_mode = #tpu.pipeline_mode<synchronous>, transform_indices = @transform_8, window_bounds = array<i64: 1, 32>}, {pipeline_mode = #tpu.pipeline_mode<synchronous>, transform_indices = @transform_9, window_bounds = array<i64: 32, 32>}, {pipeline_mode = #tpu.pipeline_mode<synchronous>, transform_indices = @transform_10, window_bounds = array<i64: 1, 32>}, {pipeline_mode = #tpu.pipeline_mode<synchronous>, transform_indices = @transform_11, window_bounds = array<i64: 32, 32>}, {pipeline_mode = #tpu.pipeline_mode<synchronous>, transform_indices = @transform_12, window_bounds = array<i64: 1, 32>}, {transform_indices = @transform_13, window_bounds = array<i64: 1, 8, 32>}]} {
    %c0 = arith.constant 0 : index
    %c0_0 = arith.constant 0 : index
    %c0_1 = arith.constant 0 : index
    %0 = vector.load %arg1[%c0, %c0_0, %c0_1] : memref<1x8x32xf32, #tpu.memory_space<vmem>>, vector<1x8x32xf32>
    %1 = vector.shape_cast %0 : vector<1x8x32xf32> to vector<8x32xf32>
    %c0_2 = arith.constant 0 : index
    %c0_3 = arith.constant 0 : index
    %c0_4 = arith.constant 0 : index
    %2 = vector.load %arg2[%c0_2, %c0_3, %c0_4] : memref<1x8x32xf32, #tpu.memory_space<vmem>>, vector<1x8x32xf32>
    %3 = vector.shape_cast %2 : vector<1x8x32xf32> to vector<8x32xf32>
    %c0_5 = arith.constant 0 : index
    %c0_6 = arith.constant 0 : index
    %c0_7 = arith.constant 0 : index
    %4 = vector.load %arg3[%c0_5, %c0_6, %c0_7] : memref<1x8x32xf32, #tpu.memory_space<vmem>>, vector<1x8x32xf32>
    %5 = vector.shape_cast %4 : vector<1x8x32xf32> to vector<8x32xf32>
    %c0_8 = arith.constant 0 : index
    %c0_9 = arith.constant 0 : index
    %6 = vector.load %arg6[%c0_8, %c0_9] : memref<32x32xf32, #tpu.memory_space<vmem>>, vector<32x32xf32>
    %7 = arith.truncf %1 : vector<8x32xf32> to vector<8x32xbf16>
    %8 = arith.truncf %6 : vector<32x32xf32> to vector<32x32xbf16>
    %cst = arith.constant dense<0.000000e+00> : vector<8x32xf32>
    %9 = tpu.matmul %7, %8, %cst {dimension_numbers = #tpu.dot_dimension_numbers<[1], [0], [0], [1], [0, 0, 1, 1], [], []>} : vector<8x32xbf16>, vector<32x32xbf16>, vector<8x32xf32> -> vector<8x32xf32>
    %c0_10 = arith.constant 0 : index
    %c0_11 = arith.constant 0 : index
    %10 = vector.load %arg7[%c0_10, %c0_11] : memref<1x32xf32, #tpu.memory_space<vmem>>, vector<1x32xf32>
    %11 = vector.broadcast %10 : vector<1x32xf32> to vector<8x32xf32>
    %12 = arith.addf %9, %11 : vector<8x32xf32>
    %c0_12 = arith.constant 0 : index
    %c0_13 = arith.constant 0 : index
    %13 = vector.load %arg8[%c0_12, %c0_13] : memref<32x32xf32, #tpu.memory_space<vmem>>, vector<32x32xf32>
    %14 = arith.truncf %3 : vector<8x32xf32> to vector<8x32xbf16>
    %15 = arith.truncf %13 : vector<32x32xf32> to vector<32x32xbf16>
    %cst_14 = arith.constant dense<0.000000e+00> : vector<8x32xf32>
    %16 = tpu.matmul %14, %15, %cst_14 {dimension_numbers = #tpu.dot_dimension_numbers<[1], [0], [0], [1], [0, 0, 1, 1], [], []>} : vector<8x32xbf16>, vector<32x32xbf16>, vector<8x32xf32> -> vector<8x32xf32>
    %c0_15 = arith.constant 0 : index
    %c0_16 = arith.constant 0 : index
    %17 = vector.load %arg9[%c0_15, %c0_16] : memref<1x32xf32, #tpu.memory_space<vmem>>, vector<1x32xf32>
    %18 = vector.broadcast %17 : vector<1x32xf32> to vector<8x32xf32>
    %19 = arith.addf %16, %18 : vector<8x32xf32>
    %c0_17 = arith.constant 0 : index
    %c0_18 = arith.constant 0 : index
    %20 = vector.load %arg10[%c0_17, %c0_18] : memref<32x32xf32, #tpu.memory_space<vmem>>, vector<32x32xf32>
    %21 = arith.truncf %5 : vector<8x32xf32> to vector<8x32xbf16>
    %22 = arith.truncf %20 : vector<32x32xf32> to vector<32x32xbf16>
    %cst_19 = arith.constant dense<0.000000e+00> : vector<8x32xf32>
    %23 = tpu.matmul %21, %22, %cst_19 {dimension_numbers = #tpu.dot_dimension_numbers<[1], [0], [0], [1], [0, 0, 1, 1], [], []>} : vector<8x32xbf16>, vector<32x32xbf16>, vector<8x32xf32> -> vector<8x32xf32>
    %c0_20 = arith.constant 0 : index
    %c0_21 = arith.constant 0 : index
    %24 = vector.load %arg11[%c0_20, %c0_21] : memref<1x32xf32, #tpu.memory_space<vmem>>, vector<1x32xf32>
    %25 = vector.broadcast %24 : vector<1x32xf32> to vector<8x32xf32>
    %26 = arith.addf %23, %25 : vector<8x32xf32>
    %c0_22 = arith.constant 0 : index
    %c0_23 = arith.constant 0 : index
    %c0_24 = arith.constant 0 : index
    %27 = vector.load %arg4[%c0_22, %c0_23, %c0_24] : memref<1x1x8xf32, #tpu.memory_space<vmem>>, vector<1x1x8xf32>
    %28 = vector.shape_cast %27 : vector<1x1x8xf32> to vector<1x8xf32>
    %cst_25 = arith.constant 5.000000e-01 : f32
    %29 = vector.broadcast %cst_25 : f32 to vector<1x8xf32>
    %30 = arith.cmpf ogt, %28, %29 : vector<1x8xf32>
    %31 = tpu.iota {dimensions = array<i32: 0>} : vector<8x8xi32>
    %32 = tpu.iota {dimensions = array<i32: 1>} : vector<8x8xi32>
    %33 = arith.cmpi sgt, %32, %31 : vector<8x8xi32>
    %34 = vector.broadcast %30 : vector<1x8xi1> to vector<8x8xi1>
    %35 = arith.ori %34, %33 : vector<8x8xi1>
    %cst_26 = arith.constant -1.000000e+32 : f32
    %cst_27 = arith.constant 0.000000e+00 : f32
    %36 = vector.broadcast %cst_26 : f32 to vector<8x8xf32>
    %37 = vector.broadcast %cst_27 : f32 to vector<8x8xf32>
    %38 = arith.select %35, %36, %37 : vector<8x8xi1>, vector<8x8xf32>
    %39 = vector.extract_strided_slice %12 {offsets = [0, 0], sizes = [8, 8], strides = [1, 1]} : vector<8x32xf32> to vector<8x8xf32>
    %40 = vector.extract_strided_slice %19 {offsets = [0, 0], sizes = [8, 8], strides = [1, 1]} : vector<8x32xf32> to vector<8x8xf32>
    %41 = vector.extract_strided_slice %26 {offsets = [0, 0], sizes = [8, 8], strides = [1, 1]} : vector<8x32xf32> to vector<8x8xf32>
    %42 = tpu.transpose %40, [1, 0] : vector<8x8xf32> -> vector<8x8xf32>
    %43 = arith.truncf %39 : vector<8x8xf32> to vector<8x8xbf16>
    %44 = arith.truncf %42 : vector<8x8xf32> to vector<8x8xbf16>
    %cst_28 = arith.constant dense<0.000000e+00> : vector<8x8xf32>
    %45 = tpu.matmul %43, %44, %cst_28 {dimension_numbers = #tpu.dot_dimension_numbers<[1], [0], [0], [1], [0, 0, 1, 1], [], []>} : vector<8x8xbf16>, vector<8x8xbf16>, vector<8x8xf32> -> vector<8x8xf32>
    %cst_29 = arith.constant 0.176776692 : f32
    %46 = vector.broadcast %cst_29 : f32 to vector<8x8xf32>
    %47 = arith.mulf %45, %46 : vector<8x8xf32>
    %48 = arith.addf %47, %38 : vector<8x8xf32>
    %cst_30 = arith.constant dense<0xFF800000> : vector<8xf32>
    %49 = vector.multi_reduction <maximumf>, %48, %cst_30 [1] : vector<8x8xf32> to vector<8xf32>
    %50 = vector.shape_cast %49 : vector<8xf32> to vector<8x1xf32>
    %51 = vector.broadcast %50 : vector<8x1xf32> to vector<8x8xf32>
    %52 = arith.subf %48, %51 : vector<8x8xf32>
    %53 = math.exp %52 : vector<8x8xf32>
    %cst_31 = arith.constant dense<0.000000e+00> : vector<8xf32>
    %54 = vector.multi_reduction <add>, %53, %cst_31 [1] : vector<8x8xf32> to vector<8xf32>
    %55 = vector.shape_cast %54 : vector<8xf32> to vector<8x1xf32>
    %56 = tpu.reciprocal %55 {approx = true} : vector<8x1xf32> -> vector<8x1xf32>
    %57 = vector.broadcast %56 : vector<8x1xf32> to vector<8x8xf32>
    %58 = arith.mulf %53, %57 : vector<8x8xf32>
    %59 = arith.truncf %58 : vector<8x8xf32> to vector<8x8xbf16>
    %60 = arith.truncf %41 : vector<8x8xf32> to vector<8x8xbf16>
    %cst_32 = arith.constant dense<0.000000e+00> : vector<8x8xf32>
    %61 = tpu.matmul %59, %60, %cst_32 {dimension_numbers = #tpu.dot_dimension_numbers<[1], [0], [0], [1], [0, 0, 1, 1], [], []>} : vector<8x8xbf16>, vector<8x8xbf16>, vector<8x8xf32> -> vector<8x8xf32>
    %62 = vector.extract_strided_slice %12 {offsets = [0, 8], sizes = [8, 8], strides = [1, 1]} : vector<8x32xf32> to vector<8x8xf32>
    %63 = vector.extract_strided_slice %19 {offsets = [0, 8], sizes = [8, 8], strides = [1, 1]} : vector<8x32xf32> to vector<8x8xf32>
    %64 = vector.extract_strided_slice %26 {offsets = [0, 8], sizes = [8, 8], strides = [1, 1]} : vector<8x32xf32> to vector<8x8xf32>
    %65 = tpu.transpose %63, [1, 0] : vector<8x8xf32> -> vector<8x8xf32>
    %66 = arith.truncf %62 : vector<8x8xf32> to vector<8x8xbf16>
    %67 = arith.truncf %65 : vector<8x8xf32> to vector<8x8xbf16>
    %cst_33 = arith.constant dense<0.000000e+00> : vector<8x8xf32>
    %68 = tpu.matmul %66, %67, %cst_33 {dimension_numbers = #tpu.dot_dimension_numbers<[1], [0], [0], [1], [0, 0, 1, 1], [], []>} : vector<8x8xbf16>, vector<8x8xbf16>, vector<8x8xf32> -> vector<8x8xf32>
    %cst_34 = arith.constant 0.176776692 : f32
    %69 = vector.broadcast %cst_34 : f32 to vector<8x8xf32>
    %70 = arith.mulf %68, %69 : vector<8x8xf32>
    %71 = arith.addf %70, %38 : vector<8x8xf32>
    %cst_35 = arith.constant dense<0xFF800000> : vector<8xf32>
    %72 = vector.multi_reduction <maximumf>, %71, %cst_35 [1] : vector<8x8xf32> to vector<8xf32>
    %73 = vector.shape_cast %72 : vector<8xf32> to vector<8x1xf32>
    %74 = vector.broadcast %73 : vector<8x1xf32> to vector<8x8xf32>
    %75 = arith.subf %71, %74 : vector<8x8xf32>
    %76 = math.exp %75 : vector<8x8xf32>
    %cst_36 = arith.constant dense<0.000000e+00> : vector<8xf32>
    %77 = vector.multi_reduction <add>, %76, %cst_36 [1] : vector<8x8xf32> to vector<8xf32>
    %78 = vector.shape_cast %77 : vector<8xf32> to vector<8x1xf32>
    %79 = tpu.reciprocal %78 {approx = true} : vector<8x1xf32> -> vector<8x1xf32>
    %80 = vector.broadcast %79 : vector<8x1xf32> to vector<8x8xf32>
    %81 = arith.mulf %76, %80 : vector<8x8xf32>
    %82 = arith.truncf %81 : vector<8x8xf32> to vector<8x8xbf16>
    %83 = arith.truncf %64 : vector<8x8xf32> to vector<8x8xbf16>
    %cst_37 = arith.constant dense<0.000000e+00> : vector<8x8xf32>
    %84 = tpu.matmul %82, %83, %cst_37 {dimension_numbers = #tpu.dot_dimension_numbers<[1], [0], [0], [1], [0, 0, 1, 1], [], []>} : vector<8x8xbf16>, vector<8x8xbf16>, vector<8x8xf32> -> vector<8x8xf32>
    %85 = vector.extract_strided_slice %12 {offsets = [0, 16], sizes = [8, 8], strides = [1, 1]} : vector<8x32xf32> to vector<8x8xf32>
    %86 = vector.extract_strided_slice %19 {offsets = [0, 16], sizes = [8, 8], strides = [1, 1]} : vector<8x32xf32> to vector<8x8xf32>
    %87 = vector.extract_strided_slice %26 {offsets = [0, 16], sizes = [8, 8], strides = [1, 1]} : vector<8x32xf32> to vector<8x8xf32>
    %88 = tpu.transpose %86, [1, 0] : vector<8x8xf32> -> vector<8x8xf32>
    %89 = arith.truncf %85 : vector<8x8xf32> to vector<8x8xbf16>
    %90 = arith.truncf %88 : vector<8x8xf32> to vector<8x8xbf16>
    %cst_38 = arith.constant dense<0.000000e+00> : vector<8x8xf32>
    %91 = tpu.matmul %89, %90, %cst_38 {dimension_numbers = #tpu.dot_dimension_numbers<[1], [0], [0], [1], [0, 0, 1, 1], [], []>} : vector<8x8xbf16>, vector<8x8xbf16>, vector<8x8xf32> -> vector<8x8xf32>
    %cst_39 = arith.constant 0.176776692 : f32
    %92 = vector.broadcast %cst_39 : f32 to vector<8x8xf32>
    %93 = arith.mulf %91, %92 : vector<8x8xf32>
    %94 = arith.addf %93, %38 : vector<8x8xf32>
    %cst_40 = arith.constant dense<0xFF800000> : vector<8xf32>
    %95 = vector.multi_reduction <maximumf>, %94, %cst_40 [1] : vector<8x8xf32> to vector<8xf32>
    %96 = vector.shape_cast %95 : vector<8xf32> to vector<8x1xf32>
    %97 = vector.broadcast %96 : vector<8x1xf32> to vector<8x8xf32>
    %98 = arith.subf %94, %97 : vector<8x8xf32>
    %99 = math.exp %98 : vector<8x8xf32>
    %cst_41 = arith.constant dense<0.000000e+00> : vector<8xf32>
    %100 = vector.multi_reduction <add>, %99, %cst_41 [1] : vector<8x8xf32> to vector<8xf32>
    %101 = vector.shape_cast %100 : vector<8xf32> to vector<8x1xf32>
    %102 = tpu.reciprocal %101 {approx = true} : vector<8x1xf32> -> vector<8x1xf32>
    %103 = vector.broadcast %102 : vector<8x1xf32> to vector<8x8xf32>
    %104 = arith.mulf %99, %103 : vector<8x8xf32>
    %105 = arith.truncf %104 : vector<8x8xf32> to vector<8x8xbf16>
    %106 = arith.truncf %87 : vector<8x8xf32> to vector<8x8xbf16>
    %cst_42 = arith.constant dense<0.000000e+00> : vector<8x8xf32>
    %107 = tpu.matmul %105, %106, %cst_42 {dimension_numbers = #tpu.dot_dimension_numbers<[1], [0], [0], [1], [0, 0, 1, 1], [], []>} : vector<8x8xbf16>, vector<8x8xbf16>, vector<8x8xf32> -> vector<8x8xf32>
    %108 = vector.extract_strided_slice %12 {offsets = [0, 24], sizes = [8, 8], strides = [1, 1]} : vector<8x32xf32> to vector<8x8xf32>
    %109 = vector.extract_strided_slice %19 {offsets = [0, 24], sizes = [8, 8], strides = [1, 1]} : vector<8x32xf32> to vector<8x8xf32>
    %110 = vector.extract_strided_slice %26 {offsets = [0, 24], sizes = [8, 8], strides = [1, 1]} : vector<8x32xf32> to vector<8x8xf32>
    %111 = tpu.transpose %109, [1, 0] : vector<8x8xf32> -> vector<8x8xf32>
    %112 = arith.truncf %108 : vector<8x8xf32> to vector<8x8xbf16>
    %113 = arith.truncf %111 : vector<8x8xf32> to vector<8x8xbf16>
    %cst_43 = arith.constant dense<0.000000e+00> : vector<8x8xf32>
    %114 = tpu.matmul %112, %113, %cst_43 {dimension_numbers = #tpu.dot_dimension_numbers<[1], [0], [0], [1], [0, 0, 1, 1], [], []>} : vector<8x8xbf16>, vector<8x8xbf16>, vector<8x8xf32> -> vector<8x8xf32>
    %cst_44 = arith.constant 0.176776692 : f32
    %115 = vector.broadcast %cst_44 : f32 to vector<8x8xf32>
    %116 = arith.mulf %114, %115 : vector<8x8xf32>
    %117 = arith.addf %116, %38 : vector<8x8xf32>
    %cst_45 = arith.constant dense<0xFF800000> : vector<8xf32>
    %118 = vector.multi_reduction <maximumf>, %117, %cst_45 [1] : vector<8x8xf32> to vector<8xf32>
    %119 = vector.shape_cast %118 : vector<8xf32> to vector<8x1xf32>
    %120 = vector.broadcast %119 : vector<8x1xf32> to vector<8x8xf32>
    %121 = arith.subf %117, %120 : vector<8x8xf32>
    %122 = math.exp %121 : vector<8x8xf32>
    %cst_46 = arith.constant dense<0.000000e+00> : vector<8xf32>
    %123 = vector.multi_reduction <add>, %122, %cst_46 [1] : vector<8x8xf32> to vector<8xf32>
    %124 = vector.shape_cast %123 : vector<8xf32> to vector<8x1xf32>
    %125 = tpu.reciprocal %124 {approx = true} : vector<8x1xf32> -> vector<8x1xf32>
    %126 = vector.broadcast %125 : vector<8x1xf32> to vector<8x8xf32>
    %127 = arith.mulf %122, %126 : vector<8x8xf32>
    %128 = arith.truncf %127 : vector<8x8xf32> to vector<8x8xbf16>
    %129 = arith.truncf %110 : vector<8x8xf32> to vector<8x8xbf16>
    %cst_47 = arith.constant dense<0.000000e+00> : vector<8x8xf32>
    %130 = tpu.matmul %128, %129, %cst_47 {dimension_numbers = #tpu.dot_dimension_numbers<[1], [0], [0], [1], [0, 0, 1, 1], [], []>} : vector<8x8xbf16>, vector<8x8xbf16>, vector<8x8xf32> -> vector<8x8xf32>
    %131 = tpu.concatenate %61, %84, %107, %130 in 1 : vector<8x8xf32>, vector<8x8xf32>, vector<8x8xf32>, vector<8x8xf32> -> vector<8x32xf32>
    %c0_48 = arith.constant 0 : index
    %c0_49 = arith.constant 0 : index
    %c0_50 = arith.constant 0 : index
    %132 = vector.load %arg5[%c0_48, %c0_49, %c0_50] : memref<1x8x1xf32, #tpu.memory_space<vmem>>, vector<1x8x1xf32>
    %133 = vector.shape_cast %132 : vector<1x8x1xf32> to vector<8x1xf32>
    %cst_51 = arith.constant 1.000000e+00 : f32
    %134 = vector.broadcast %cst_51 : f32 to vector<8x1xf32>
    %135 = arith.subf %134, %133 : vector<8x1xf32>
    %136 = vector.broadcast %135 : vector<8x1xf32> to vector<8x32xf32>
    %137 = arith.mulf %131, %136 : vector<8x32xf32>
    %c0_52 = arith.constant 0 : index
    %c0_53 = arith.constant 0 : index
    %138 = vector.load %arg12[%c0_52, %c0_53] : memref<32x32xf32, #tpu.memory_space<vmem>>, vector<32x32xf32>
    %139 = arith.truncf %137 : vector<8x32xf32> to vector<8x32xbf16>
    %140 = arith.truncf %138 : vector<32x32xf32> to vector<32x32xbf16>
    %cst_54 = arith.constant dense<0.000000e+00> : vector<8x32xf32>
    %141 = tpu.matmul %139, %140, %cst_54 {dimension_numbers = #tpu.dot_dimension_numbers<[1], [0], [0], [1], [0, 0, 1, 1], [], []>} : vector<8x32xbf16>, vector<32x32xbf16>, vector<8x32xf32> -> vector<8x32xf32>
    %c0_55 = arith.constant 0 : index
    %c0_56 = arith.constant 0 : index
    %142 = vector.load %arg13[%c0_55, %c0_56] : memref<1x32xf32, #tpu.memory_space<vmem>>, vector<1x32xf32>
    %143 = vector.broadcast %142 : vector<1x32xf32> to vector<8x32xf32>
    %144 = arith.addf %141, %143 : vector<8x32xf32>
    %c0_57 = arith.constant 0 : index
    %c0_58 = arith.constant 0 : index
    %c0_59 = arith.constant 0 : index
    %145 = vector.load %arg14[%c0_57, %c0_58, %c0_59] : memref<1x8x32xf32, #tpu.memory_space<vmem>>, vector<1x8x32xf32>
    %146 = vector.shape_cast %145 : vector<1x8x32xf32> to vector<8x32xf32>
    %147 = vector.shape_cast %144 : vector<8x32xf32> to vector<1x8x32xf32>
    tpu.vector_store %arg14[%c0_57, %c0_58, %c0_59], %147 {strides = array<i32>} : memref<1x8x32xf32, #tpu.memory_space<vmem>>, vector<1x8x32xf32>,
    return
  }
  func.func @transform_0(%arg0: i32) -> (i32, i32, i32) {
    %c0_i32 = arith.constant 0 : i32
    %c0_i32_0 = arith.constant 0 : i32
    %c0_i32_1 = arith.constant 0 : i32
    return %arg0, %c0_i32, %c0_i32_0 : i32, i32, i32
  }
  func.func @transform_1(%arg0: i32) -> (i32, i32, i32) {
    %c0_i32 = arith.constant 0 : i32
    %c0_i32_0 = arith.constant 0 : i32
    %c0_i32_1 = arith.constant 0 : i32
    return %arg0, %c0_i32, %c0_i32_0 : i32, i32, i32
  }
  func.func @transform_2(%arg0: i32) -> (i32, i32, i32) {
    %c0_i32 = arith.constant 0 : i32
    %c0_i32_0 = arith.constant 0 : i32
    %c0_i32_1 = arith.constant 0 : i32
    return %arg0, %c0_i32, %c0_i32_0 : i32, i32, i32
  }
  func.func @transform_3(%arg0: i32) -> (i32, i32, i32) {
    %c0_i32 = arith.constant 0 : i32
    %c0_i32_0 = arith.constant 0 : i32
    %c0_i32_1 = arith.constant 0 : i32
    return %arg0, %c0_i32, %c0_i32_0 : i32, i32, i32
  }
  func.func @transform_4(%arg0: i32) -> (i32, i32, i32) {
    %c0_i32 = arith.constant 0 : i32
    %c0_i32_0 = arith.constant 0 : i32
    %c0_i32_1 = arith.constant 0 : i32
    return %arg0, %c0_i32, %c0_i32_0 : i32, i32, i32
  }
  func.func @transform_5(%arg0: i32) -> (i32, i32) {
    %c0_i32 = arith.constant 0 : i32
    %c0_i32_0 = arith.constant 0 : i32
    %c0_i32_1 = arith.constant 0 : i32
    return %c0_i32, %c0_i32_0 : i32, i32
  }
  func.func @transform_6(%arg0: i32) -> (i32, i32) {
    %c0_i32 = arith.constant 0 : i32
    %c0_i32_0 = arith.constant 0 : i32
    %c0_i32_1 = arith.constant 0 : i32
    return %c0_i32, %c0_i32_0 : i32, i32
  }
  func.func @transform_7(%arg0: i32) -> (i32, i32) {
    %c0_i32 = arith.constant 0 : i32
    %c0_i32_0 = arith.constant 0 : i32
    %c0_i32_1 = arith.constant 0 : i32
    return %c0_i32, %c0_i32_0 : i32, i32
  }
  func.func @transform_8(%arg0: i32) -> (i32, i32) {
    %c0_i32 = arith.constant 0 : i32
    %c0_i32_0 = arith.constant 0 : i32
    %c0_i32_1 = arith.constant 0 : i32
    return %c0_i32, %c0_i32_0 : i32, i32
  }
  func.func @transform_9(%arg0: i32) -> (i32, i32) {
    %c0_i32 = arith.constant 0 : i32
    %c0_i32_0 = arith.constant 0 : i32
    %c0_i32_1 = arith.constant 0 : i32
    return %c0_i32, %c0_i32_0 : i32, i32
  }
  func.func @transform_10(%arg0: i32) -> (i32, i32) {
    %c0_i32 = arith.constant 0 : i32
    %c0_i32_0 = arith.constant 0 : i32
    %c0_i32_1 = arith.constant 0 : i32
    return %c0_i32, %c0_i32_0 : i32, i32
  }
  func.func @transform_11(%arg0: i32) -> (i32, i32) {
    %c0_i32 = arith.constant 0 : i32
    %c0_i32_0 = arith.constant 0 : i32
    %c0_i32_1 = arith.constant 0 : i32
    return %c0_i32, %c0_i32_0 : i32, i32
  }
  func.func @transform_12(%arg0: i32) -> (i32, i32) {
    %c0_i32 = arith.constant 0 : i32
    %c0_i32_0 = arith.constant 0 : i32
    %c0_i32_1 = arith.constant 0 : i32
    return %c0_i32, %c0_i32_0 : i32, i32
  }
  func.func @transform_13(%arg0: i32) -> (i32, i32, i32) {
    %c0_i32 = arith.constant 0 : i32
    %c0_i32_0 = arith.constant 0 : i32
    %c0_i32_1 = arith.constant 0 : i32
    return %arg0, %c0_i32, %c0_i32_0 : i32, i32, i32
  }
}

</mosaic_0001>

<bundles_post_ra>
// kernel: tpu_custom_call.1
= control target key start
LH: loop header
LB: loop body
LE: loop exit
PB: predicated region body
PF: predicated region fallthrough
CT: control target
= control target key end

     0   :  { %s2705_s0 = inlined_call_operand.hbm [shape: f32[2,8,32], index: 0, kind: input, shape index: {}]   ;;  %s2706_s1 = inlined_call_operand.hbm [shape: f32[2,8,32], index: 1, kind: input, shape index: {}]   ;;  %s2707_s2 = inlined_call_operand.hbm [shape: f32[2,8,32], index: 2, kind: input, shape index: {}]   ;;  %s2708_s3 = inlined_call_operand.vmem [shape: f32[2,1,8], index: 3, kind: input, shape index: {}]   ;;  %s2709_s4 = inlined_call_operand.vmem [shape: f32[2,8,1], index: 4, kind: input, shape index: {}]   ;;  %s2710_s5 = inlined_call_operand.vmem [shape: f32[32,32], index: 5, kind: input, shape index: {}]   ;;  %s2711_s6 = inlined_call_operand.vmem [shape: f32[1,32], index: 6, kind: input, shape index: {}]   ;;  %s2712_s7 = inlined_call_operand.hbm [shape: f32[32,32], index: 7, kind: input, shape index: {}]   ;;  %s2713_s8 = inlined_call_operand.vmem [shape: f32[1,32], index: 8, kind: input, shape index: {}]   ;;  %s2714_s9 = inlined_call_operand.hbm [shape: f32[32,32], index: 9, kind: input, shape index: {}]   ;;  %s2715_s10 = inlined_call_operand.vmem [shape: f32[1,32], index: 10, kind: input, shape index: {}]   ;;  %s2716_s11 = inlined_call_operand.hbm [shape: f32[32,32], index: 11, kind: input, shape index: {}]   ;;  %s2717_s12 = inlined_call_operand.vmem [shape: f32[1,32], index: 12, kind: input, shape index: {}]   ;;  %s2718_s13 = inlined_call_operand.hbm [shape: f32[2,8,32], index: 13, kind: output, shape index: {}]  }
   0x1   :  { %2744 = sst [smem:[#allocation25_spill]] %s2706_s1 }
   0x2   :  { %2745 = sst [smem:[#allocation26_spill]] %s2708_s3 }
   0x3   :  { %2746 = sst [smem:[#allocation27_spill]] %s2709_s4 }
   0x4   :  { %2747 = sst [smem:[#allocation28_spill]] %s2711_s6 }
   0x5   :  { %2748 = sst [smem:[#allocation29_spill]] %s2712_s7 }
   0x6   :  { %2749 = sst [smem:[#allocation30_spill]] %s2715_s10 }
   0x7   :  { %2750 = sst [smem:[#allocation31_spill]] %s2717_s12 }
   0x8   :  { %2751 = sst [smem:[#allocation32_spill]] %s2718_s13 }
   0x9   :  { %18 = vsyncpa [#allocation3], 0 }
   0xa   :  { %20 = vsyncpa [#allocation3 + $0x1], 0 }
   0xb   :  { %21 = vsyncpa [#allocation6], 0 }
   0xc   :  { %23 = vsyncpa [#allocation6 + $0x1], 0 }
   0xd   :  { %24 = vsyncpa [#allocation9], 0 }
   0xe   :  { %25 = vsyncpa [#allocation12], 0 }
   0xf   :  { %26 = vsyncpa [#allocation4], 0 }
  0x10   :  { %28 = vsyncpa [#allocation4 + $0x1], 0  ;;  %s2250_s25 = smov 0   ;;  %s2252_s26 = smov 0  }
  0x11   :  { %s2254_s27 = smov 0   ;;  %s2256_s28 = smov 0  }
  0x12 LB: > { %2752 = sst [smem:[#allocation19_spill]] %s2148_s25  ;;  %s2271_s29 = sadd.s32 4294967295, %s2160_s28   ;;  %s2160_s28 = sphi %s2256_s28, %s2796_s28   ;;  %s2156_s27 = sphi %s2254_s27, %s2800_s27   ;;  %s2152_s26 = sphi %s2252_s26, %s2799_s26   ;;  %s2148_s25 = sphi %s2250_s25, %s2798_s25  }
  0x13   : > { %2753 = sst [smem:[#allocation20_spill]] %s2160_s28  ;;  %s1637_s30 = sadd.s32 4294967294, %s2160_s28  }
  0x14   : > { %p54_p0 = scmp.ne.s32.totalorder %s2152_s26, %s2148_s25  ;;  %p2722_p1 = scmp.eq.s32.totalorder %s2271_s29, 0 }
  0x15   : > { %p356_p3 = scmp.eq.s32.totalorder %s1637_s30, 1  ;;  %p1638_p5 = scmp.ge.s32.totalorder %s2160_s28, 1 }
  0x16   : > { %p2280_p4 = por %p2722_p1, %p54_p0  ;;  %p363_p7 = scmp.lt.s32.totalorder %s2160_s28, 3 }
  0x17   : > { %p2285_p6 = por %p356_p3, %p54_p0  ;;  %s2162_s17 = smov [#allocation8]  }
  0x18   : > { %s2754_s14 = scalar_select %p2280_p4, 1, 0 }
  0x19   : > { %s2755_s15 = scalar_select %p2285_p6, 1, 0 }
  0x1a   : > { %p2290_p8 = pnand %p1638_p5, %p363_p7  ;;  %s381_s18 = sshll.u32 %s2162_s17, 4  ;;  %s2294_s18 = int_to_ptr.vmem [resolvable:$true] %s381_s18 }
  0x1b   : > { %2756 = sst [smem:[#allocation21_spill]] %s2755_s15  ;;  %s2306_s20 = sadd.s32 1, %s2160_s28  }
  0x1c   : > { %s2757_s16 = scalar_select %p2290_p8, 1, 0 }
  0x1d   : > { %p1806_p9 = pneg %p2290_p8  ;;  %2759 = sst [smem:[#allocation22_spill]] %s2306_s20 }
  0x1e   : > { %s41_s21 = sadd.s32 1, %s2156_s27  ;;  %s38_s22 = ssub.s32 %s2160_s28, %s2306_s20 }
  0x1f   : > { %p2301_p11 = pnand %p1806_p9, %p2722_p1  ;;  %s2760_s7 = sld [smem:[#allocation29_spill]] }
  0x21   : > { %s2758_s19 = scalar_select %p2301_p11, 1, 0 }
  0x22   : > { %p2319_p13 = pneg %p2301_p11 }
  0x24   : > { %s2761_s25 = scalar_select %p2319_p13, 1, 0 }
  0x25   : > { %s1908_s30 = scalar_lea.hbm %s2760_s7, 512 }
  0x26   : > { %p1909_p12 = scmp.ne.s32.totalorder %s2760_s7, %s1908_s30  ;;  %p1915_p5 = scmp.lt.u32.totalorder %s1908_s30, %s2760_s7 }
  0x28   : > { %p1911_p0 = pnand %p2319_p13, %p1909_p12 }
  0x2a   : > { %p1912_p3 = pneg %p1911_p0 }
  0x2c   : > { %p1917_p7 = pnand %p1915_p5, %p1912_p3 }
  0x2e   : > { %1920 = shalt.err (!%p1917_p7)
}
  0x2f   : > { %s1921_s15 = scalar_lea.vmem %s2294_s18, 512  ;;  %p1929_p2 = scmp.lt.s32.totalorder %s2294_s18, %s2294_s18 }
  0x30   : > { %p1922_p9 = scmp.ne.s32.totalorder %s2294_s18, %s1921_s15  ;;  %p1930_p6 = scmp.lt.s32.totalorder %s1921_s15, %s1921_s15 }
  0x32   : > { %p1924_p10 = pnand %p1922_p9, %p2319_p13  ;;  %p1931_p12 = por %p1930_p6, %p1929_p2 }
  0x34   : > { %p1925_p1 = pneg %p1924_p10 }
  0x36   : > { %p1932_p0 = pnand %p1931_p12, %p1925_p1 }
  0x38   : > { %1935 = shalt.err (!%p1932_p0)
}
  0x39   : > { %s2725_s23 = smov 128   ;;  %s2727_s12 = smov 8  }
  0x3a   : > { %1809 = dma.hbm_to_vmem [thread:$0]  (!%p2301_p11), %s2760_s7, 512, %s2294_s18, [#allocation9], %s2725_s23, %s2725_s23, %s2727_s12  }
  0x3b   : > { %p39_p1 = scmp.eq.s32.totalorder %s38_s22, 0  ;;  %p48_p2 = scmp.ne.s32.totalorder %s2156_s27, %s2152_s26 }
  0x3c   : > { %p49_p6 = scmp.eq.s32.totalorder %s2160_s28, 0  ;;  %p1833_p10 = scmp.lt.s32.totalorder %s2160_s28, 2 }
  0x3d   : > { %s2348_s30 = scalar_select %p39_p1, %s2156_s27, %s41_s21  }
  0x3e   : > { %p50_p3 = por %p49_p6, %p48_p2  ;;  %p2763_p5 = scmp.eq.s32.totalorder %s2271_s29, 1 }
  0x3f   : > { %2762 = sst [smem:[#allocation23_spill]] %s2348_s30  ;;  %s2729_s15 = sand.u32 1, %s2156_s27  }
  0x40   : > { %p2352_p7 = por %p2763_p5, %p48_p2  ;;  %s2358_s20 = sshll.u32 %s2160_s28, 7 }
  0x41   : > { %s2362_s4 = sshll.u32 %s2729_s15, 3  ;;  %p2364_p9 = pnand %p1833_p10, %p50_p3 }
  0x42   : > { %s2764_s17 = scalar_select %p2352_p7, 1, 0 }
  0x43   : > { %s2766_s18 = scalar_select %p2364_p9, 1, 0 }
  0x44   : > { %2765 = sst [smem:[#allocation24_spill]] %s2764_s17  ;;  %s448_s21 = sand.u32 1, %s2160_s28  }
  0x45   : > { %s2767_s1 = sld [smem:[#allocation25_spill]]  ;;  %s452_s23 = scalar_lea.vmem [#allocation5], %s2362_s4 }
  0x46   : > { %s459_s12 = sshll.u32 %s452_s23, 4  ;;  %s2378_s15 = scalar_lea.sflag [#allocation6], %s448_s21  ;;  %s2376_s12 = int_to_ptr.vmem [resolvable:$true] %s459_s12 }
  0x47   : > { %p2384_p0 = pneg %p2364_p9 }
  0x49   : > { %s2768_s30 = scalar_select %p2384_p0, 1, 0 }
  0x4b   : > { %s2373_s24 = scalar_lea.hbm %s2767_s1, %s2358_s20  ;;  %s1941_s28 = scalar_lea.hbm %s2767_s1, 256 }
  0x4c   : > { %s1936_s7 = scalar_lea.hbm %s2373_s24, 128  ;;  %p1942_p6 = scmp.lt.u32.totalorder %s2373_s24, %s2767_s1 }
  0x4d   : > { %p1937_p12 = scmp.ne.s32.totalorder %s2373_s24, %s1936_s7  ;;  %p1943_p10 = scmp.lt.u32.totalorder %s1941_s28, %s1936_s7 }
  0x4e   : > { %p1945_p5 = scmp.lt.u32.totalorder %s1936_s7, %s2373_s24 }
  0x4f   : > { %p1939_p1 = pnand %p2384_p0, %p1937_p12  ;;  %p1944_p3 = por %p1943_p10, %p1942_p6 }
  0x51   : > { %p1940_p2 = pneg %p1939_p1  ;;  %p1946_p7 = por %p1945_p5, %p1944_p3 }
  0x53   : > { %p1947_p4 = pnand %p1946_p7, %p1940_p2 }
  0x55   : > { %1950 = shalt.err (!%p1947_p4)
}
  0x56   : > { %s1951_s21 = scalar_lea.vmem %s2376_s12, 128  ;;  %s2165_s22 = smov [#allocation5]  }
  0x57   : > { %p1952_p12 = scmp.ne.s32.totalorder %s2376_s12, %s1951_s21  ;;  %s1956_s13 = sshll.u32 %s2165_s22, 4  ;;  %s1957_s13 = int_to_ptr.vmem [resolvable:$false] %s1956_s13 }
  0x58   : > { %s1958_s17 = scalar_lea.vmem %s1957_s13, 256  ;;  %p1959_p11 = scmp.lt.s32.totalorder %s2376_s12, %s1957_s13 }
  0x59   : > { %p1954_p1 = pnand %p1952_p12, %p2384_p0  ;;  %p1960_p13 = scmp.lt.s32.totalorder %s1958_s17, %s1951_s21 }
  0x5b   : > { %p1955_p8 = pneg %p1954_p1  ;;  %p1961_p6 = por %p1960_p13, %p1959_p11 }
  0x5d   : > { %p1962_p10 = pnand %p1961_p6, %p1955_p8 }
  0x5f   : > { %1965 = shalt.err (!%p1962_p10)
}
  0x60   : > { %1822 = dma.hbm_to_vmem [thread:$0]  (!%p2364_p9), %s2373_s24, 128, %s2376_s12, %s2378_s15  }
  0x61   : > { %s2166_s7 = smov [#allocation10]   ;;  %s2167_s23 = smov [#allocation11]  }
  0x62   : > { %s397_s28 = sshll.u32 %s2166_s7, 4  ;;  %s413_s1 = sshll.u32 %s2167_s23, 4  ;;  %s398_s28 = int_to_ptr.vmem [resolvable:$true] %s397_s28  ;;  %s414_s1 = int_to_ptr.vmem [resolvable:$true] %s413_s1 }
  0x63   : > { %s1966_s13 = scalar_lea.hbm %s2714_s9, 512  ;;  %p2769_p8 = scmp.ne.s32.totalorder %s2761_s25, 0 }
  0x64   : > { %p1967_p4 = scmp.ne.s32.totalorder %s2714_s9, %s1966_s13  ;;  %p1973_p7 = scmp.lt.u32.totalorder %s1966_s13, %s2714_s9 }
  0x66   : > { %p1969_p11 = pnand %p1967_p4, %p2769_p8 }
  0x68   : > { %p1970_p13 = pneg %p1969_p11 }
  0x6a   : > { %p1975_p2 = pnand %p1973_p7, %p1970_p13 }
  0x6c   : > { %1978 = shalt.err (!%p1975_p2)
}
  0x6d   : > { %s1979_s12 = scalar_lea.vmem %s398_s28, 512  ;;  %p1987_p1 = scmp.lt.s32.totalorder %s398_s28, %s398_s28 }
  0x6e   : > { %p1980_p3 = scmp.ne.s32.totalorder %s398_s28, %s1979_s12  ;;  %p1988_p6 = scmp.lt.s32.totalorder %s1979_s12, %s1979_s12 }
  0x70   : > { %p1982_p5 = pnand %p1980_p3, %p2769_p8  ;;  %p1989_p10 = por %p1988_p6, %p1987_p1 }
  0x72   : > { %p1983_p12 = pneg %p1982_p5 }
  0x74   : > { %p1990_p9 = pnand %p1989_p10, %p1983_p12 }
  0x76   : > { %1993 = shalt.err (!%p1990_p9)
}
  0x77   : > { %p2770_p4 = scmp.ne.s32.totalorder %s2758_s19, 0  ;;  %s2771_s10 = smov 8  }
  0x78   : > { %s2772_s24 = smov 128   ;;  %s1994_s22 = scalar_lea.hbm %s2716_s11, 512 }
  0x79   : > { %1812 = dma.hbm_to_vmem [thread:$0]  (!%p2770_p4), %s2714_s9, 512, %s398_s28, [#allocation9], %s2772_s24, %s2772_s24, %s2771_s10  }
  0x7a   : > { %p1995_p11 = scmp.ne.s32.totalorder %s2716_s11, %s1994_s22  ;;  %p2001_p7 = scmp.lt.u32.totalorder %s1994_s22, %s2716_s11 }
  0x7c   : > { %p1997_p9 = pnand %p1995_p11, %p2769_p8 }
  0x7e   : > { %p1998_p13 = pneg %p1997_p9 }
  0x80   : > { %p2003_p2 = pnand %p2001_p7, %p1998_p13 }
  0x82   : > { %2006 = shalt.err (!%p2003_p2)
}
  0x83   : > { %s2007_s3 = scalar_lea.vmem %s414_s1, 512  ;;  %p2015_p1 = scmp.lt.s32.totalorder %s414_s1, %s414_s1 }
  0x84   : > { %p2008_p3 = scmp.ne.s32.totalorder %s414_s1, %s2007_s3  ;;  %p2016_p6 = scmp.lt.s32.totalorder %s2007_s3, %s2007_s3 }
  0x86   : > { %p2010_p5 = pnand %p2008_p3, %p2769_p8  ;;  %p2017_p10 = por %p2016_p6, %p2015_p1 }
  0x88   : > { %p2011_p12 = pneg %p2010_p5 }
  0x8a   : > { %p2018_p0 = pnand %p2017_p10, %p2011_p12 }
  0x8c   : > { %2021 = shalt.err (!%p2018_p0)
}
  0x8d   : > { %1815 = dma.hbm_to_vmem [thread:$0]  (!%p2770_p4), %s2716_s11, 512, %s414_s1, [#allocation12], %s2772_s24, %s2772_s24, %s2771_s10  }
  0x8e   : > { %s2454_s23 = scalar_lea.hbm %s2705_s0, %s2358_s20  ;;  %s434_s19 = scalar_lea.vmem [#allocation2], %s2362_s4 }
  0x8f   : > { %s441_s22 = sshll.u32 %s434_s19, 4  ;;  %s2463_s17 = scalar_lea.hbm %s2707_s2, %s2358_s20  ;;  %s2457_s22 = int_to_ptr.vmem [resolvable:$true] %s441_s22 }
  0x90   : > { %s2773_s12 = sand.u32 1, %s2156_s27   ;;  %s2022_s10 = scalar_lea.hbm %s2454_s23, 128 }
  0x91   : > { %s431_s1 = scalar_lea.sflag [#allocation3], %s2773_s12  ;;  %p2023_p0 = scmp.ne.s32.totalorder %s2454_s23, %s2022_s10 }
  0x92   : > { %p2774_p8 = scmp.ne.s32.totalorder %s2768_s30, 0  ;;  %s2027_s28 = scalar_lea.hbm %s2705_s0, 256 }
  0x93   : > { %p2028_p9 = scmp.lt.u32.totalorder %s2454_s23, %s2705_s0  ;;  %p2029_p13 = scmp.lt.u32.totalorder %s2027_s28, %s2022_s10 }
  0x94   : > { %p2025_p4 = pnand %p2023_p0, %p2774_p8  ;;  %p2031_p2 = scmp.lt.u32.totalorder %s2022_s10, %s2454_s23 }
  0x95   : > { %p2030_p7 = por %p2029_p13, %p2028_p9 }
  0x96   : > { %p2026_p11 = pneg %p2025_p4 }
  0x97   : > { %p2032_p3 = por %p2031_p2, %p2030_p7 }
  0x99   : > { %p2033_p5 = pnand %p2032_p3, %p2026_p11 }
  0x9b   : > { %2036 = shalt.err (!%p2033_p5)
}
  0x9c   : > { %s2037_s20 = scalar_lea.vmem %s2457_s22, 128  ;;  %s2168_s7 = smov [#allocation2]  }
  0x9d   : > { %p2038_p12 = scmp.ne.s32.totalorder %s2457_s22, %s2037_s20  ;;  %s2042_s19 = sshll.u32 %s2168_s7, 4  ;;  %s2043_s19 = int_to_ptr.vmem [resolvable:$false] %s2042_s19 }
  0x9e   : > { %s2044_s13 = scalar_lea.vmem %s2043_s19, 256  ;;  %p2045_p10 = scmp.lt.s32.totalorder %s2457_s22, %s2043_s19 }
  0x9f   : > { %p2040_p1 = pnand %p2038_p12, %p2774_p8  ;;  %p2046_p0 = scmp.lt.s32.totalorder %s2044_s13, %s2037_s20 }
  0xa1   : > { %p2041_p6 = pneg %p2040_p1  ;;  %p2047_p4 = por %p2046_p0, %p2045_p10 }
  0xa3   : > { %p2048_p9 = pnand %p2047_p4, %p2041_p6 }
  0xa5   : > { %2051 = shalt.err (!%p2048_p9)
}
  0xa6   : > { %p2775_p11 = scmp.ne.s32.totalorder %s2766_s18, 0  ;;  %s470_s21 = scalar_lea.vmem [#allocation7], %s2362_s4 }
  0xa7   : > { %s477_s12 = sshll.u32 %s470_s21, 4  ;;  %s2052_s10 = scalar_lea.hbm %s2463_s17, 128  ;;  %s478_s12 = int_to_ptr.vmem [resolvable:$true] %s477_s12 }
  0xa8   : > { %1819 = dma.hbm_to_vmem [thread:$0]  (!%p2775_p11), %s2454_s23, 128, %s2457_s22, %s431_s1  }
  0xa9   : > { %p2053_p13 = scmp.ne.s32.totalorder %s2463_s17, %s2052_s10  ;;  %s2057_s28 = scalar_lea.hbm %s2707_s2, 256 }
  0xaa   : > { %p2058_p3 = scmp.lt.u32.totalorder %s2463_s17, %s2707_s2  ;;  %p2059_p5 = scmp.lt.u32.totalorder %s2057_s28, %s2052_s10 }
  0xab   : > { %p2055_p7 = pnand %p2053_p13, %p2774_p8  ;;  %p2061_p1 = scmp.lt.u32.totalorder %s2052_s10, %s2463_s17 }
  0xac   : > { %p2060_p12 = por %p2059_p5, %p2058_p3 }
  0xad   : > { %p2056_p2 = pneg %p2055_p7 }
  0xae   : > { %p2062_p6 = por %p2061_p1, %p2060_p12 }
  0xb0   : > { %p2063_p10 = pnand %p2062_p6, %p2056_p2 }
  0xb2   : > { %2066 = shalt.err (!%p2063_p10)
}
  0xb3   : > { %s2067_s4 = scalar_lea.vmem %s478_s12, 128  ;;  %s2169_s23 = smov [#allocation7]  }
  0xb4   : > { %p2068_p0 = scmp.ne.s32.totalorder %s478_s12, %s2067_s4  ;;  %s2072_s22 = sshll.u32 %s2169_s23, 4  ;;  %s2073_s22 = int_to_ptr.vmem [resolvable:$false] %s2072_s22 }
  0xb5   : > { %s2074_s1 = scalar_lea.vmem %s2073_s22, 256  ;;  %p2075_p13 = scmp.lt.s32.totalorder %s478_s12, %s2073_s22 }
  0xb6   : > { %p2070_p4 = pnand %p2068_p0, %p2774_p8  ;;  %p2076_p7 = scmp.lt.s32.totalorder %s2074_s1, %s2067_s4 }
  0xb8   : > { %p2071_p9 = pneg %p2070_p4  ;;  %p2077_p11 = por %p2076_p7, %p2075_p13 }
  0xba   : > { %p2078_p3 = pnand %p2077_p11, %p2071_p9 }
  0xbc   : > { %2081 = shalt.err (!%p2078_p3)
}
  0xbd   : > { %p2776_p5 = scmp.ne.s32.totalorder %s2766_s18, 0  ;;  %p2777_p2 = scmp.ne.s32.totalorder %s2757_s16, 0 }
  0xbe   : > { %s2510_s30 = sand.u32 (!%p2777_p2), 1, %s2152_s26   ;;  %p2778_p8 = scmp.ne.s32.totalorder (!%p2777_p2), %s2754_s14, 0 }
  0xbf   : > { %1825 = dma.hbm_to_vmem [thread:$0]  (!%p2776_p5), %s2463_s17, 128, %s478_s12, %s2378_s15  }
  0xc0   : > { %499 = sbr.rel (%p2777_p2) target bundleno = 1840 (0x730), region = 72  ;;  %s2513_s20 = sshll.u32 (!%p2777_p2), %s2510_s30, 3 }
  0xc1   : > { %s502_s7 = scalar_lea.sflag (!%p2777_p2), [#allocation3], %s2510_s30  ;;  %s505_s19 = scalar_lea.vmem (!%p2777_p2), [#allocation2], %s2513_s20 }
  0xc7   : > { %2127 = dma.done.wait (%p2778_p8), %s502_s7, 128  }
  0xc8   : > { %2129 = vsyncadd (%p2778_p8), %s502_s7, 4294967168  ;;  %s510_s16 = sand.u32 1, %s2271_s29   ;;  %s514_s18 = scalar_lea.vmem [#allocation5], %s2513_s20 }
  0xc9   : > { %s511_s15 = scalar_lea.sflag [#allocation6], %s510_s16 }
  0xca   : > { %2131 = dma.done.wait (%p2778_p8), %s511_s15, 256  }
  0xcb   : > { %2133 = vsyncadd (%p2778_p8), %s511_s15, 4294967040  ;;  %s523_s17 = scalar_lea.vmem [#allocation7], %s2513_s20  ;;  %p2779_p11 = scmp.eq.s32.totalorder %s2271_s29, 0 }
  0xcd   : > { %2135 = dma.done.wait (%p2779_p11), [#allocation9], 1024   ;;  %p2780_p12 = pmov %p2779_p11 }
  0xce   : > { %p2781_p1 = pmov %p2779_p11 }
  0xcf   : > { %2137 = vsyncadd (%p2780_p12), [#allocation9], 4294966272 }
  0xd0   : > { %2139 = dma.done.wait (%p2781_p1), [#allocation12], 512   ;;  %p2782_p6 = pmov %p2781_p1 }
  0xd1   : > { %v2170_v0 = vmov 0.0   ;;  %vm2171_vm0 = vmmov 0   ;;  %v664_v1 = vld [vmem:[#allocation8] sm:$0xff]  ;;  %v665_v2 = vld [vmem:[#allocation8 + $0x8] sm:$0xff]  ;;  %v666_v3 = vld [vmem:[#allocation8 + $0x10] sm:$0xff]  ;;  %vm620_vm1 = vcmask 261120   ;;  %v780_v59 = vlaneseq }
  0xd2   : > { %2141 = vsyncadd (%p2782_p6), [#allocation12], 4294966784  ;;  %1714 = vmatprep.subr.bf16.mxu1 %v2170_v0  ;;  %1718 = vmatprep.mubr.msk.bf16.mxu1 %vm2171_vm0, %v2170_v0  ;;  %v669_v4 = vpack.c.bf16 %v665_v2, %v664_v1  ;;  %v667_v5 = vld [vmem:[#allocation8 + $0x18] sm:$0xff]  ;;  %v606_v6 = vld [vmem:[%s2710_s5] sm:$0xff]  ;;  %s2783_s22 = sld [smem:[#allocation28_spill]]  ;;  %s2172_s1 = smov 104  }
  0xd3   : > { %1706 = vmatprep.subr.bf16.mxu0 %v2170_v0  ;;  %1710 = vmatprep.mubr.msk.bf16.mxu0 %vm2171_vm0, %v2170_v0  ;;  %v607_v7 = vld [vmem:[%s2710_s5 + $0x8] sm:$0xff]  ;;  %v608_v8 = vld [vmem:[%s2710_s5 + $0x10] sm:$0xff]  ;;  %v609_v9 = vld [vmem:[%s2710_s5 + $0x18] sm:$0xff]  ;;  %v670_v10 = vpack.c.bf16 %v667_v5, %v666_v3  ;;  %s2173_s7 = smov 120   ;;  %vm831_vm2 = vcmask 1043456   ;;  %vm827_vm3 = vcmask 64512  }
  0xd4   : > { %1715 = vmatpush3.bf16.msra.mxu1 %v669_v4  ;;  %v604_v11 = vld [vmem:[%s514_s18] sm:$0xff]  ;;  %v611_v12 = vpack.c.bf16 %v607_v7, %v606_v6  ;;  %v612_v13 = vpack.c.bf16 %v609_v9, %v608_v8  ;;  %v603_v14 = vld [vmem:[%s505_s19] sm:$0xff]  ;;  %s2174_s19 = smov 112   ;;  %v2175_v58 = vmov 0   ;;  %p595_p10 = scmp.lt.s32.totalorder %s2271_s29, 1  ;;  %v781_v61 = vshrl.u32 %v780_v59, 7 }
  0xd5   : > { %1716 = vmatprep.subr.bf16.mxu1 %v2170_v0  ;;  %v668_v15 = vpack.c.bf16 %v604_v11, %v604_v11  ;;  %v610_v16 = vpack.c.bf16 %v603_v14, %v603_v14  ;;  %v1660_v17 = vld [vmem:[%s2713_s8] ss:$0 sm:$0xff]  ;;  %v721_v34 = vld [vmem:[#allocation10] sm:$0xff]  ;;  %v722_v35 = vld [vmem:[#allocation10 + $0x8] sm:$0xff]  ;;  %v783_v1 = vand.u32 127, %v780_v59  ;;  %s2785_s12 = sld [smem:[#allocation30_spill]] }
  0xd6   : > { %1707 = vmatpush3.bf16.msra.mxu0 %v611_v12  ;;  %v723_v36 = vld [vmem:[#allocation10 + $0x10] sm:$0xff]  ;;  %v726_v37 = vpack.c.bf16 %v722_v35, %v721_v34  ;;  %v724_v38 = vld [vmem:[#allocation10 + $0x18] sm:$0xff]  ;;  %s2607_s16 = scalar_select %p595_p10, %s2271_s29, 1  ;;  %v788_v62 = vsub.s32 0, %v781_v61  ;;  %vm1390_vm8 = vcmask 130048   ;;  %vm1392_vm9 = vcmask 195584  }
  0xd7   : > { %1708 = vmatprep.subr.bf16.mxu0 %v2170_v0  ;;  %v727_v39 = vpack.c.bf16 %v724_v38, %v723_v36  ;;  %v605_v40 = vld [vmem:[%s523_s17] sm:$0xff]  ;;  %s2784_s17 = sld [smem:[#allocation26_spill]]  ;;  %vm784_vm5 = vcmp.gt.s32.totalorder %v783_v1, %v781_v61  ;;  %s2786_s28 = sld [smem:[#allocation27_spill]] }
  0xd8   : > { %1717 = vmatpush3.bf16.msra.mxu1 %v670_v10  ;;  %v1658_v19 = vld [vmem:[%s2783_s22] ss:$0 sm:$0xff]  ;;  %v725_v41 = vpack.c.bf16 %v605_v40, %v605_v40  ;;  %s1657_s10 = sshll.u32 %s2607_s16, 3  ;;  %s2176_s25 = smov 8  }
  0xd9   : > { %1730 = vmatprep.subr.bf16.mxu1 %v2170_v0  ;;  %s2177_s4 = smov 16   ;;  %s2178_s23 = smov 24  }
  0xda   : > { %1709 = vmatpush3.bf16.msra.mxu0 %v612_v13  ;;  %s594_s15 = scalar_lea.vmem [#allocation13], %s2513_s20  ;;  %s2789_s13 = sld [smem:[#allocation32_spill]] }
  0xdb   : > { %1719 = vmatmul.mubr.msk.bf16.vlgmr.msra.gmra.mrb[0].mxu1 %vm620_vm1, %v668_v15  ;;  %1722 = vmatprep.subr.bf16.mxu0 %v2170_v0  ;;  %s1474_s18 = sshll.u32 %s594_s15, 4  ;;  %s2662_s18 = int_to_ptr.vmem [resolvable:$true] %s1474_s18 }
  0xdc   : > { %1732 = vmatprep.mubr.msk.bf16.mxu1 %vm2171_vm0, %v2170_v0  ;;  %s2082_s20 = scalar_lea.vmem %s2662_s18, 128 }
  0xdd   : > { %1711 = vmatmul.mubr.msk.bf16.vlgmr.msra.gmra.mrb[0].mxu0 %vm620_vm1, %v610_v16  ;;  %s597_s14 = scalar_lea.vmem %s2784_s17, %s2607_s16  ;;  %s601_s6 = scalar_lea.vmem %s2786_s28, %s1657_s10 }
  0xde   : > { %1726 = vmatprep.mubr.msk.bf16.mxu0 %vm2171_vm0, %v2170_v0  ;;  %1723 = vmatpush3.bf16.msra.mxu0 %v726_v37  ;;  %v778_v60 = vld [vmem:[%s597_s14] sm:$0x1]  ;;  %s1675_s16 = sshll.u32 %s2271_s29, 7  ;;  %s1461_s29 = scalar_lea.sflag [#allocation4], %s2510_s30 }
  0xdf   : > { %1724 = vmatprep.subr.bf16.mxu0 %v2170_v0  ;;  %vm779_vm4 = vcmp.gt.f32.partialorder %v778_v60, 0.5  ;;  %p2083_p0 = scmp.ne.s32.totalorder %s2662_s18, %s2082_s20 }
  0xe0   : > { %v785_v63 = vsel %vm779_vm4, 1, %v2175_v58  ;;  %s2660_s21 = scalar_lea.hbm %s2789_s13, %s1675_s16 }
  0xe1   : > { %v789_v2 = vrot.slane %v785_v63, %v788_v62 }
  0xe2   : > { %1725 = vmatpush3.bf16.msra.mxu0 %v727_v39 }
  0xe3   : > { %1736 = vmatprep.subr.bf16.mxu0 %v2170_v0  ;;  %vm790_vm6 = vcmp.eq.s32.totalorder %v789_v2, 1 }
  0xe4   : > { %vm791_vm7 = vmor %vm790_vm6, %vm784_vm5 }
  0xe5   : > { %1727 = vmatmul.mubr.msk.bf16.vlgmr.msra.gmra.mrb[4].mxu0 %vm620_vm1, %v725_v41  ;;  %v792_v4 = vsel %vm791_vm7, -1e+32, %v2170_v0 }
  0xe6   : > { %1738 = vmatprep.mubr.msk.bf16.mxu0 %vm2171_vm0, %v2170_v0 }
 0x1ae   : > { %v715_v18 = vpop.f32.mrb[0].mxu1 }
 0x1af   : > { %v716_v20 = vadd.f32 %v1660_v17, %v715_v18  ;;  %v1720_v21 = vpop.f32.mrb[1].mxu1 }
 0x1b0   : > { %v718_v22 = vpop.f32.mrb[2].mxu1  ;;  %v658_v23 = vpop.f32.mrb[0].mxu0 }
 0x1b1   : > { %1231 = vrot.lane.b32.xlu1 %v716_v20, %s2172_s1  ;;  %937 = vrot.lane.b32.xlu0 %v716_v20, %s2173_s7  ;;  %v1721_v24 = vpop.f32.mrb[3].mxu1  ;;  %v659_v25 = vadd.f32 %v1658_v19, %v658_v23  ;;  %v1712_v26 = vpop.f32.mrb[1].mxu0 }
 0x1b2   : > { %v661_v27 = vpop.f32.mrb[2].mxu0 }
 0x1b3   : > { %v825_v28 = vpack.c.bf16 %v659_v25, %v659_v25  ;;  %v1713_v29 = vpop.f32.mrb[3].mxu0 }
 0x1b5   : > { %1085 = vrot.lane.b32.xlu0 %v716_v20, %s2174_s19  ;;  %974 = vrot.lane.b32.xlu1 %v825_v28, %s2173_s7 }
 0x1b9   : > { %1121 = vrot.lane.b32.xlu0 %v825_v28, %s2174_s19 }
 0x1bd   : > { %1267 = vrot.lane.b32.xlu0 %v825_v28, %s2172_s1 }
 0x223   : > { %v938_v30 = vpop.permute.xlu0 %937  ;;  %v1232_v33 = vpop.permute.xlu1 %1231 }
 0x224   : > { %v1884_v31 = vpack.i.bf16 %v938_v30, %v716_v20 }
 0x226   : > { %1885 = vxpose.xlu1.b32.start.end [1/1] (short) (narrow) %v1884_v31, 8 }
 0x227   : > { %v1086_v32 = vpop.permute.xlu0 %1085  ;;  %v975_v42 = vpop.permute.xlu1 %974 }
 0x228   : > { %1088 = vxpose.xlu0.b32.start.end [1/1] (short) (narrow) %v1086_v32, 8  ;;  %v1662_v32 = vld [vmem:[%s2785_s12] ss:$0 sm:$0xff]  ;;  %s2179_s12 = smov [#allocation13]  }
 0x229   : > { %s2086_s10 = sshll.u32 %s2179_s12, 4  ;;  %s2087_s10 = int_to_ptr.vmem [resolvable:$false] %s2086_s10 }
 0x22a   : > { %s2088_s24 = scalar_lea.vmem %s2087_s10, 256  ;;  %p2089_p7 = scmp.lt.s32.totalorder %s2662_s18, %s2087_s10 }
 0x22b   : > { %v1122_v43 = vpop.permute.xlu0 %1121  ;;  %p2090_p3 = scmp.lt.s32.totalorder %s2088_s24, %s2082_s20 }
 0x22c   : > { %1234 = vxpose.xlu0.b32.start.end [1/1] (short) (narrow) %v1232_v33, 8  ;;  %v772_v33 = vpop.f32.mrb[4].mxu0 }
 0x22d   : > { %v773_v34 = vadd.f32 %v1662_v32, %v772_v33  ;;  %v1728_v35 = vpop.f32.mrb[5].mxu0  ;;  %p2091_p5 = por %p2090_p3, %p2089_p7 }
 0x22e   : > { %v775_v36 = vpop.f32.mrb[6].mxu0 }
 0x22f   : > { %v1268_v48 = vpop.permute.xlu0 %1267  ;;  %v1729_v37 = vpop.f32.mrb[7].mxu0  ;;  %v889_v38 = vpack.c.bf16 %v773_v34, %v773_v34  ;;  %v1404_v36 = vld [vmem:[#allocation11 + $0x10] sm:$0xff] }
 0x230   : > { %v1405_v37 = vld [vmem:[#allocation11 + $0x18] sm:$0xff] }
 0x231   : > { %v894_v39 = vsel %vm831_vm2, %v889_v38, 0 }
 0x232   : > { %1737 = vmatpush3.bf16.msra.mxu0 %v894_v39 }
 0x233   : > { %1748 = vmatprep.subr.bf16.mxu0 %v2170_v0 }
 0x255   : > { %1891 = vset.pattern.permute.xlu0 %v2175_v58 }
 0x2a6   : > { %v1886_v44 = vpop.trf.xlu1 }
 0x2a7   : > { %v1890_v45 = vunpack.i.h.bf16 %v1886_v44  ;;  %v1887_v46 = vunpack.i.l.bf16 %v1886_v44 }
 0x2a8   : > { %v1104_v51 = vpop.trf.xlu0 }
 0x2a9   : > { %v826_v47 = vpack.c.bf16 %v1887_v46, %v1887_v46  ;;  %v972_v50 = vpack.c.bf16 %v1890_v45, %v1890_v45  ;;  %v1120_v53 = vpack.c.bf16 %v1104_v51, %v1104_v51 }
 0x2ab   : > { %v833_v49 = vsel %vm831_vm2, %v826_v47, 0  ;;  %v980_v52 = vsel %vm831_vm2, %v972_v50, 0  ;;  %v1127_v54 = vsel %vm831_vm2, %v1120_v53, 0 }
 0x2ac   : > { %1731 = vmatpush3.bf16.msra.mxu1 %v833_v49  ;;  %v1250_v55 = vpop.trf.xlu0 }
 0x2ad   : > { %1742 = vmatprep.subr.bf16.mxu1 %v2170_v0  ;;  %v1266_v56 = vpack.c.bf16 %v1250_v55, %v1250_v55 }
 0x2af   : > { %1733 = vmatmul.mubr.msk.bf16.vlgmr.msra.gmra.mrb[4].mxu1 %vm827_vm3, %v825_v28  ;;  %v1273_v57 = vsel %vm831_vm2, %v1266_v56, 0 }
 0x2b0   : > { %1743 = vmatpush3.bf16.msra.mxu1 %v980_v52  ;;  %1744 = vmatprep.mubr.msk.bf16.mxu1 %vm2171_vm0, %v2170_v0 }
 0x2b1   : > { %1754 = vmatprep.subr.bf16.mxu1 %v2170_v0 }
 0x2b7   : > { %1745 = vmatmul.mubr.msk.bf16.vlgmr.msra.gmra.mrb[8].mxu1 %vm827_vm3, %v975_v42 }
 0x2b8   : > { %1755 = vmatpush3.bf16.msra.mxu1 %v1127_v54  ;;  %1756 = vmatprep.mubr.msk.bf16.mxu1 %vm2171_vm0, %v2170_v0 }
 0x2b9   : > { %1766 = vmatprep.subr.bf16.mxu1 %v2170_v0 }
 0x2bf   : > { %1757 = vmatmul.mubr.msk.bf16.vlgmr.msra.gmra.mrb[12].mxu1 %vm827_vm3, %v1122_v43 }
 0x2c0   : > { %1767 = vmatpush3.bf16.msra.mxu1 %v1273_v57  ;;  %1768 = vmatprep.mubr.msk.bf16.mxu1 %vm2171_vm0, %v2170_v0 }
 0x2c1   : > { %1778 = vmatprep.subr.bf16.mxu1 %v2170_v0 }
 0x2c7   : > { %1769 = vmatmul.mubr.msk.bf16.vlgmr.msra.gmra.mrb[16].mxu1 %vm827_vm3, %v1268_v48 }
 0x2c8   : > { %1782 = vmatprep.mubr.msk.bf16.mxu1 %vm2171_vm0, %v2170_v0 }
 0x382   : > { %v869_v3 = vpop.f32.mrb[4].mxu1 }
 0x383   : > { %v875_v5 = vmul.f32 0.17677669, %v869_v3  ;;  %v1734_v6 = vpop.f32.mrb[5].mxu1 }
 0x384   : > { %v872_v7 = vpop.f32.mrb[6].mxu1 }
 0x385   : > { %v1735_v8 = vpop.f32.mrb[7].mxu1  ;;  %v876_v9 = vadd.f32 %v875_v5, %v792_v4 }
 0x387   : > { %v877_v10 = vsel %vm827_vm3, %v876_v9, -inf }
 0x388   : > { %878 = vmax.xlane.f32.xlu1 %v877_v10 }
 0x38a   : > { %v1016_v11 = vpop.f32.mrb[8].mxu1 }
 0x38b   : > { %v1022_v12 = vmul.f32 0.17677669, %v1016_v11  ;;  %v1746_v13 = vpop.f32.mrb[9].mxu1 }
 0x38c   : > { %v1019_v14 = vpop.f32.mrb[10].mxu1 }
 0x38d   : > { %v1747_v15 = vpop.f32.mrb[11].mxu1  ;;  %v1023_v16 = vadd.f32 %v1022_v12, %v792_v4 }
 0x38f   : > { %v1024_v17 = vsel %vm827_vm3, %v1023_v16, -inf }
 0x390   : > { %1025 = vmax.xlane.f32.xlu0 %v1024_v17 }
 0x392   : > { %v1163_v18 = vpop.f32.mrb[12].mxu1 }
 0x393   : > { %v1169_v19 = vmul.f32 0.17677669, %v1163_v18  ;;  %v1758_v20 = vpop.f32.mrb[13].mxu1 }
 0x394   : > { %v1166_v21 = vpop.f32.mrb[14].mxu1 }
 0x395   : > { %v1759_v22 = vpop.f32.mrb[15].mxu1  ;;  %v1170_v23 = vadd.f32 %v1169_v19, %v792_v4  ;;  %v1394_v19 = vld [vmem:[%s601_s6] sm:$0xff] }
 0x396   : > { %v1395_v20 = vsub.f32 1.0, %v1394_v19 }
 0x397   : > { %v1171_v24 = vsel %vm827_vm3, %v1170_v23, -inf }
 0x398   : > { %1172 = vmax.xlane.f32.xlu1 %v1171_v24 }
 0x39a   : > { %v1309_v25 = vpop.f32.mrb[16].mxu1 }
 0x39b   : > { %v1315_v26 = vmul.f32 0.17677669, %v1309_v25  ;;  %v1770_v27 = vpop.f32.mrb[17].mxu1  ;;  %v1402_v25 = vld [vmem:[#allocation11] sm:$0xff] }
 0x39c   : > { %v1312_v28 = vpop.f32.mrb[18].mxu1 }
 0x39d   : > { %v1771_v29 = vpop.f32.mrb[19].mxu1  ;;  %v1316_v30 = vadd.f32 %v1315_v26, %v792_v4  ;;  %v1403_v26 = vld [vmem:[#allocation11 + $0x8] sm:$0xff] }
 0x39e   : > { %v1407_v27 = vpack.c.bf16 %v1403_v26, %v1402_v25 }
 0x39f   : > { %v1317_v31 = vsel %vm827_vm3, %v1316_v30, -inf }
 0x3a0   : > { %1318 = vmax.xlane.f32.xlu1 %v1317_v31  ;;  %1779 = vmatpush3.bf16.msra.mxu1 %v1407_v27 }
 0x3a1   : > { %1780 = vmatprep.subr.bf16.mxu1 %v2170_v0 }
 0x415   : > { %v879_v40 = vpop.xlane.xlu1 %878 }
 0x416   : > { %v880_v41 = vsub.f32 %v876_v9, %v879_v40 }
 0x418   : > { %v881_v42 = vmul.f32 1.442695, %v880_v41 }
 0x41a   : > { %1892 = vpow2.f32 %v881_v42 }
 0x41d   : > { %v1026_v43 = vpop.xlane.xlu0 %1025 }
 0x41e   : > { %v1027_v44 = vsub.f32 %v1023_v16, %v1026_v43 }
 0x420   : > { %v1028_v45 = vmul.f32 1.442695, %v1027_v44 }
 0x422   : > { %1894 = vpow2.f32 %v1028_v45 }
 0x424   : > { %v1893_v46 = vpop.eup %1892 }
 0x425   : > { %v1173_v47 = vpop.xlane.xlu1 %1172  ;;  %v883_v48 = vsel %vm827_vm3, %v1893_v46, 0.0 }
 0x426   : > { %v1174_v49 = vsub.f32 %v1170_v23, %v1173_v47  ;;  %884 = vadd.xlane.f32.xlu0 %v883_v48 }
 0x428   : > { %v1175_v50 = vmul.f32 1.442695, %v1174_v49 }
 0x42a   : > { %1896 = vpow2.f32 %v1175_v50 }
 0x42c   : > { %v1895_v51 = vpop.eup %1894 }
 0x42d   : > { %v1030_v52 = vsel %vm827_vm3, %v1895_v51, 0.0  ;;  %v1319_v55 = vpop.xlane.xlu1 %1318 }
 0x42e   : > { %1031 = vadd.xlane.f32.xlu1 %v1030_v52  ;;  %v1320_v56 = vsub.f32 %v1316_v30, %v1319_v55 }
 0x430   : > { %v1321_v57 = vmul.f32 1.442695, %v1320_v56 }
 0x432   : > { %1898 = vpow2.f32 %v1321_v57 }
 0x434   : > { %v1897_v53 = vpop.eup %1896 }
 0x435   : > { %v1177_v54 = vsel %vm827_vm3, %v1897_v53, 0.0 }
 0x436   : > { %1178 = vadd.xlane.f32.xlu0 %v1177_v54 }
 0x43c   : > { %v1899_v58 = vpop.eup %1898 }
 0x43d   : > { %v1323_v59 = vsel %vm827_vm3, %v1899_v58, 0.0 }
 0x43f   : > { %1183 = vrot.lane.b32.xlu1 %v889_v38, %s2174_s19  ;;  %s2788_s19 = sld [smem:[#allocation24_spill]] }
 0x445   : > { %p2790_p4 = scmp.ne.s32.totalorder %s2788_s19, 0 }
 0x447   : > { %p2084_p9 = pnand %p2083_p0, %p2790_p4 }
 0x449   : > { %p2085_p13 = pneg %p2084_p9 }
 0x44b   : > { %p2092_p2 = pnand %p2091_p5, %p2085_p13 }
 0x44c   : > { %1037 = vrot.lane.b32.xlu0 %v889_v38, %s2173_s7  ;;  %s2787_s7 = sld [smem:[#allocation31_spill]] }
 0x450   : > { %1398 = vperm.xlu0 %1891, %v1395_v20  }
 0x463   : > { %1324 = vadd.xlane.f32.xlu1 %v1323_v59 }
 0x474   : > { %1329 = vrot.lane.b32.xlu1 %v889_v38, %s2172_s1  ;;  %v1408_v38 = vpack.c.bf16 %v1405_v37, %v1404_v36 }
 0x476   : > { %1781 = vmatpush3.bf16.msra.mxu1 %v1408_v38 }
 0x4b3   : > { %v885_v60 = vpop.xlane.xlu0 %884 }
 0x4b4   : > { %1900 = vrcp.f32 %v885_v60 }
 0x4bb   : > { %v1032_v61 = vpop.xlane.xlu1 %1031 }
 0x4bc   : > { %1902 = vrcp.f32 %v1032_v61 }
 0x4be   : > { %v1901_v62 = vpop.eup %1900 }
 0x4bf   : > { %v887_v63 = vmul.f32 %v1901_v62, %v1893_v46  ;;  %v1184_v7 = vpop.permute.xlu1 %1183 }
 0x4c0   : > { %v1189_v9 = vsel %vm831_vm2, %v1184_v7, 0 }
 0x4c1   : > { %v888_v1 = vpack.c.bf16 %v887_v63, %v887_v63 }
 0x4c3   : > { %v1179_v2 = vpop.xlane.xlu0 %1178  ;;  %1739 = vmatmul.mubr.msk.bf16.vlgmr.msra.gmra.mrb[8].mxu0 %vm827_vm3, %v888_v1 }
 0x4c4   : > { %1904 = vrcp.f32 %v1179_v2  ;;  %1750 = vmatprep.mubr.msk.bf16.mxu0 %vm2171_vm0, %v2170_v0 }
 0x4c6   : > { %v1903_v3 = vpop.eup %1902 }
 0x4c7   : > { %v1034_v4 = vmul.f32 %v1903_v3, %v1895_v51  ;;  %v1038_v5 = vpop.permute.xlu0 %1037  ;;  %v1672_v51 = vld [vmem:[%s2787_s7] ss:$0 sm:$0xff] }
 0x4c8   : > { %v1043_v6 = vsel %vm831_vm2, %v1038_v5, 0 }
 0x4c9   : > { %1749 = vmatpush3.bf16.msra.mxu0 %v1043_v6  ;;  %v1035_v8 = vpack.c.bf16 %v1034_v4, %v1034_v4 }
 0x4ca   : > { %1760 = vmatprep.subr.bf16.mxu0 %v2170_v0 }
 0x4cc   : > { %1751 = vmatmul.mubr.msk.bf16.vlgmr.msra.gmra.mrb[12].mxu0 %vm827_vm3, %v1035_v8 }
 0x4cd   : > { %1761 = vmatpush3.bf16.msra.mxu0 %v1189_v9  ;;  %1762 = vmatprep.mubr.msk.bf16.mxu0 %vm2171_vm0, %v2170_v0 }
 0x4ce   : > { %v1905_v10 = vpop.eup %1904  ;;  %1772 = vmatprep.subr.bf16.mxu0 %v2170_v0 }
 0x4cf   : > { %v1181_v11 = vmul.f32 %v1905_v10, %v1897_v53  ;;  %v1399_v43 = vpop.permute.xlu0 %1398 }
 0x4d1   : > { %v1182_v12 = vpack.c.bf16 %v1181_v11, %v1181_v11 }
 0x4d4   : > { %1763 = vmatmul.mubr.msk.bf16.vlgmr.msra.gmra.mrb[16].mxu0 %vm827_vm3, %v1182_v12 }
 0x4d5   : > { %1774 = vmatprep.mubr.msk.bf16.mxu0 %vm2171_vm0, %v2170_v0 }
 0x4f0   : > { %v1325_v13 = vpop.xlane.xlu1 %1324 }
 0x4f1   : > { %1906 = vrcp.f32 %v1325_v13 }
 0x4f4   : > { %v1330_v14 = vpop.permute.xlu1 %1329 }
 0x4f5   : > { %v1335_v15 = vsel %vm831_vm2, %v1330_v14, 0 }
 0x4f6   : > { %1773 = vmatpush3.bf16.msra.mxu0 %v1335_v15 }
 0x4fb   : > { %v1907_v16 = vpop.eup %1906 }
 0x4fc   : > { %v1327_v17 = vmul.f32 %v1907_v16, %v1899_v58 }
 0x4fe   : > { %v1328_v18 = vpack.c.bf16 %v1327_v17, %v1327_v17 }
 0x500   : > { %1775 = vmatmul.mubr.msk.bf16.vlgmr.msra.gmra.mrb[20].mxu0 %vm827_vm3, %v1328_v18 }
 0x596   : > { %v930_v21 = vpop.f32.mrb[8].mxu0 }
 0x597   : > { %v1740_v22 = vpop.f32.mrb[9].mxu0 }
 0x598   : > { %v933_v23 = vpop.f32.mrb[10].mxu0 }
 0x599   : > { %v1741_v24 = vpop.f32.mrb[11].mxu0 }
 0x59f   : > { %v1079_v28 = vpop.f32.mrb[12].mxu0 }
 0x5a0   : > { %1378 = vrot.lane.b32.xlu1 %v1079_v28, %s2176_s25  ;;  %v1752_v29 = vpop.f32.mrb[13].mxu0 }
 0x5a1   : > { %v1082_v30 = vpop.f32.mrb[14].mxu0 }
 0x5a2   : > { %v1753_v31 = vpop.f32.mrb[15].mxu0 }
 0x5a7   : > { %v1225_v32 = vpop.f32.mrb[16].mxu0 }
 0x5a8   : > { %1382 = vrot.lane.b32.xlu1 %v1225_v32, %s2177_s4  ;;  %v1764_v33 = vpop.f32.mrb[17].mxu0 }
 0x5a9   : > { %v1228_v34 = vpop.f32.mrb[18].mxu0 }
 0x5aa   : > { %v1765_v35 = vpop.f32.mrb[19].mxu0 }
 0x5d3   : > { %v1371_v39 = vpop.f32.mrb[20].mxu0 }
 0x5d4   : > { %1386 = vrot.lane.b32.xlu0 %v1371_v39, %s2178_s23  ;;  %v1776_v40 = vpop.f32.mrb[21].mxu0 }
 0x5d5   : > { %v1374_v0 = vpop.f32.mrb[22].mxu0 }
 0x5d6   : > { %v1777_v41 = vpop.f32.mrb[23].mxu0 }
 0x612   : > { %v1379_v42 = vpop.permute.xlu1 %1378 }
 0x613   : > { %v1389_v45 = vsel %vm827_vm3, %v930_v21, %v1379_v42 }
 0x61a   : > { %v1383_v44 = vpop.permute.xlu1 %1382 }
 0x61b   : > { %v1391_v46 = vsel %vm1390_vm8, %v1389_v45, %v1383_v44 }
 0x646   : > { %v1387_v47 = vpop.permute.xlu0 %1386 }
 0x647   : > { %v1393_v48 = vsel %vm1392_vm9, %v1391_v46, %v1387_v47 }
 0x648   : > { %v1401_v49 = vmul.f32 %v1399_v43, %v1393_v48 }
 0x64a   : > { %v1406_v50 = vpack.c.bf16 %v1401_v49, %v1401_v49 }
 0x64c   : > { %1783 = vmatmul.mubr.msk.bf16.vlgmr.msra.gmra.mrb[20].mxu1 %vm620_vm1, %v1406_v50 }
 0x71f   : > { %v1453_v52 = vpop.f32.mrb[20].mxu1 }
 0x720   : > { %v1454_v53 = vadd.f32 %v1672_v51, %v1453_v52  ;;  %v1784_v54 = vpop.f32.mrb[21].mxu1 }
 0x721   : > { %v1456_v55 = vpop.f32.mrb[22].mxu1 }
 0x722   : > { %v1785_v56 = vpop.f32.mrb[23].mxu1  ;;  %1459 = vst.msk [vmem:[%s594_s15] sm:$0xff] %vm620_vm1, %v1454_v53 }
 0x723   : > { %2095 = shalt.err (!%p2092_p2)
}
 0x724   : > { %s2096_s30 = scalar_lea.hbm %s2660_s21, 128  ;;  %s2100_s6 = scalar_lea.hbm %s2789_s13, 256 }
 0x725   : > { %p2097_p8 = scmp.ne.s32.totalorder %s2660_s21, %s2096_s30  ;;  %p2101_p1 = scmp.lt.u32.totalorder %s2660_s21, %s2789_s13 }
 0x726   : > { %p2102_p6 = scmp.lt.u32.totalorder %s2100_s6, %s2096_s30  ;;  %p2104_p0 = scmp.lt.u32.totalorder %s2096_s30, %s2660_s21 }
 0x727   : > { %p2098_p11 = pnand %p2097_p8, %p2790_p4 }
 0x728   : > { %p2103_p10 = por %p2102_p6, %p2101_p1 }
 0x729   : > { %p2099_p12 = pneg %p2098_p11 }
 0x72a   : > { %p2105_p9 = por %p2104_p0, %p2103_p10 }
 0x72c   : > { %p2106_p13 = pnand %p2105_p9, %p2099_p12 }
 0x72e   : > { %2109 = shalt.err (!%p2106_p13)
}
 0x72f   : > { %1804 = dma.vmem_to_hbm [thread:$0]  (%p2790_p4), %s2662_s18, 128, %s2660_s21, %s1461_s29  }
 0x730 PF: > { %s2791_s23 = sld [smem:[#allocation19_spill]]  ;;  %s2792_s22 = sld [smem:[#allocation21_spill]] }
 0x731   : > { %s2793_s1 = sld [smem:[#allocation20_spill]] }
 0x736   : > { %s1486_s7 = sand.u32 1, %s2791_s23   ;;  %p2794_p7 = scmp.ne.s32.totalorder %s2792_s22, 0 }
 0x737   : > { %p2795_p3 = scmp.ge.s32.totalorder %s2793_s1, 2  ;;  %s1487_s16 = scalar_lea.sflag [#allocation4], %s1486_s7 }
 0x739   : > { %p1827_p5 = pnand %p2795_p3, %p2794_p7 }
 0x73b   : > { %2143 = dma.done.wait (!%p1827_p5), %s1487_s16, 128  }
 0x73c   : > { %2145 = vsyncadd (!%p1827_p5), %s1487_s16, 4294967168  ;;  %s2796_s28 = sld [smem:[#allocation22_spill]]  ;;  %s2797_s15 = sld [smem:[#allocation23_spill]] }
 0x73d   : > { %s2798_s25 = smov %s2152_s26  ;;  %s2799_s26 = smov %s2156_s27 }
 0x742   : > { %p31_p2 = scmp.ge.s32.totalorder %s2796_s28, 4   ;;  %s2800_s27 = smov %s2797_s15 }
 0x744   :  { %33 = sbr.rel (!%p31_p2) target bundleno = 18 (0x12), region = 159 }
 0x74b   :  { %1492 = vsyncpa [#allocation3], 1 }
 0x74c   :  { %1494 = vsyncpa [#allocation3 + $0x1], 1 }
 0x74d   :  { %1495 = vsyncpa [#allocation6], 1 }
 0x74e   :  { %1497 = vsyncpa [#allocation6 + $0x1], 1 }
 0x74f   :  { %1498 = vsyncpa [#allocation9], 1 }
 0x750   :  { %1499 = vsyncpa [#allocation12], 1 }
 0x751   :  { %1500 = vsyncpa [#allocation4], 1 }
 0x752   :  { %1502 = vsyncpa [#allocation4 + $0x1], 1 }

</bundles_post_ra>
